<compile_context>
chip_gen: v7x
topology: tpu7x:2x2x1
jax: 0.10.0
libtpu: 0.0.40
codegen_flags: <defaults>
</compile_context>

<pallas_src>
import functools

import jax
import jax.numpy as jnp
from jax import lax
from jax.experimental import pallas as pl
from jax.experimental.pallas import tpu as pltpu

SENSORY_OUTPUTS = 7
IN_FEATURES = 4096 + 25 + 2  # 4123

# Max rows per batch tile.  1024 double-buffered f32 x tiles ≈ 34.6 MiB padded,
# which fits every generation once vmem_limit_bytes is raised explicitly.
DEFAULT_MAX_TILE_B = 1024

# Below this many rows the batch is not worth splitting into >1 tile.
_MIN_SPLIT_ROWS = 128

_LANE = 128
_SUBLANE = 8


def _round_up(x, m):
    return ((x + m - 1) // m) * m


def _choose_tile_b(B, max_tile_b):
    """Pick an 8-aligned batch tile giving an even count of near-equal tiles."""
    B8 = _round_up(max(B, 1), _SUBLANE)
    if B8 <= 2 * _MIN_SPLIT_ROWS:
        # Tiny batch: single (possibly padded) tile, nothing to balance.
        return min(B8, max_tile_b)
    n = pl.cdiv(B, max_tile_b)
    n = max(n, 2)          # at least 2 tiles so v7x's two TCs both get work
    if n % 2 == 1:
        n += 1             # even tile count balances the two TensorCores
    return _round_up(pl.cdiv(B, n), _SUBLANE)


def _vmem_limit_bytes(tb, x_itemsize, w_itemsize):
    """Explicit scoped-VMEM limit: actual footprint + 25% headroom, capped."""
    k_pad = _round_up(IN_FEATURES, _LANE)            # 4224
    n_pad = _LANE                                    # 7 -> 128 lanes
    x_bufs = 2 * tb * k_pad * x_itemsize             # double-buffered x tiles
    o_bufs = 2 * tb * n_pad * 4                      # double-buffered f32 out
    w_buf = _round_up(SENSORY_OUTPUTS, _SUBLANE) * k_pad * w_itemsize
    b_buf = _SUBLANE * n_pad * 4
    needed = x_bufs + o_bufs + w_buf + b_buf
    limit = needed + needed // 4 + (2 << 20)         # headroom + internal scratch
    return max(32 << 20, min(limit, 56 << 20))       # stay under v7x 64 MiB/TC


def _audio_sensory_kernel(x_ref, w_ref, b_ref, o_ref):
    # x_ref: (TB, K)   w_ref: (N, K)   b_ref: (1, N)   o_ref: (TB, N)
    # Contract x's K (dim 1) against w's K (dim 1)  ==  x @ W^T on the MXU,
    # accumulating in f32 regardless of input dtype.
    y = lax.dot_general(
        x_ref[...],
        w_ref[...],
        dimension_numbers=(((1,), (1,)), ((), ())),
        preferred_element_type=jnp.float32,
    )
    y = y + b_ref[...]
    # jax.nn.sigmoid: exp + reciprocal land on the EUP slot (free under the
    # DMA-bound x stream) and are numerically robust for large |y|.
    o_ref[...] = jax.nn.sigmoid(y).astype(o_ref.dtype)


@functools.partial(jax.jit, static_argnames=("max_tile_b",))
def audio_sensory_forward(x, weight, bias, *, max_tile_b=DEFAULT_MAX_TILE_B):
    """x: (B, 4123), weight: (7, 4123) (native PyTorch layout), bias: (7,).

    Accepts f32 or bf16 x/weight (no wrapper-side casting is performed);
    accumulation and the output are always f32.
    """
    B, K = x.shape
    N = weight.shape[0]

    tb = _choose_tile_b(B, max_tile_b)
    grid = (pl.cdiv(B, tb),)

    b2d = bias.reshape(1, N).astype(jnp.float32)

    cost = pl.CostEstimate(
        flops=2 * B * K * N,
        transcendentals=B * N,
        bytes_accessed=B * K * x.dtype.itemsize
        + K * N * weight.dtype.itemsize
        + B * N * 4
        + N * 4,
    )

    return pl.pallas_call(
        _audio_sensory_kernel,
        out_shape=jax.ShapeDtypeStruct((B, N), jnp.float32),
        grid_spec=pltpu.PrefetchScalarGridSpec(
            num_scalar_prefetch=0,
            grid=grid,
            in_specs=[
                pl.BlockSpec((tb, K), lambda i: (i, 0)),   # x: walk batch tiles
                pl.BlockSpec((N, K), lambda i: (0, 0)),    # weight: VMEM-resident
                pl.BlockSpec((1, N), lambda i: (0, 0)),    # bias: VMEM-resident
            ],
            out_specs=pl.BlockSpec((tb, N), lambda i: (i, 0)),
        ),
        compiler_params=pltpu.CompilerParams(
            # Batch tiles are independent -> v7x's 2 TensorCores split them.
            dimension_semantics=("parallel",),
            # Explicit scoped-VMEM limit so the large tiles compile
            # deterministically across v5e/v6e/v7x.
            vmem_limit_bytes=_vmem_limit_bytes(
                tb, x.dtype.itemsize, weight.dtype.itemsize
            ),
        ),
        cost_estimate=cost,
    )(x, weight, b2d)


def init_params(key):
    """Deterministic init mimicking nn.Linear default: U(-1/sqrt(fan_in), 1/sqrt(fan_in))."""
    k_w, k_b = jax.random.split(key)
    bound = 1.0 / jnp.sqrt(jnp.float32(IN_FEATURES))
    weight = jax.random.uniform(
        k_w, (SENSORY_OUTPUTS, IN_FEATURES), jnp.float32, minval=-bound, maxval=bound
    )
    bias = jax.random.uniform(
        k_b, (SENSORY_OUTPUTS,), jnp.float32, minval=-bound, maxval=bound
    )
    return weight, bias


if __name__ == "__main__":
    key = jax.random.PRNGKey(0)
    k_x, k_p = jax.random.split(key)

    batch = 2
    x = jax.random.normal(k_x, (batch, IN_FEATURES), jnp.float32)
    weight, bias = init_params(k_p)

    out = audio_sensory_forward(x, weight, bias)
    out = jax.block_until_ready(out)

    # Sanity check against plain-JAX reference (f32 path).
    ref = jax.nn.sigmoid(x @ weight.T + bias)
    assert out.shape == (batch, SENSORY_OUTPUTS)
    assert jnp.allclose(out, ref, atol=1e-5, rtol=1e-5)

    # Multi-tile batch: exercises the balanced-tile path (B=300 -> 2 x 152 rows).
    big_b = 300
    xb = jax.random.normal(k_x, (big_b, IN_FEATURES), jnp.float32)
    outb = jax.block_until_ready(audio_sensory_forward(xb, weight, bias))
    refb = jax.nn.sigmoid(xb @ weight.T + bias)
    assert outb.shape == (big_b, SENSORY_OUTPUTS)
    assert jnp.allclose(outb, refb, atol=1e-5, rtol=1e-5)

    # Larger batch: exercises the big-tile path with the explicit VMEM limit.
    huge_b = 2304
    xh = jax.random.normal(k_x, (huge_b, IN_FEATURES), jnp.float32)
    outh = jax.block_until_ready(audio_sensory_forward(xh, weight, bias))
    refh = jax.nn.sigmoid(xh @ weight.T + bias)
    assert outh.shape == (huge_b, SENSORY_OUTPUTS)
    assert jnp.allclose(outh, refh, atol=1e-5, rtol=1e-5)

    print("KERNEL_OK")
</pallas_src>

<mosaic_0001>
module attributes {stable_mosaic.version = 11 : i64} {
  func.func @_audio_sensory_kernel(%arg0: i32, %arg1: memref<8x4123xf32, #tpu.memory_space<vmem>>, %arg2: memref<7x4123xf32, #tpu.memory_space<vmem>>, %arg3: memref<1x7xf32, #tpu.memory_space<vmem>>, %arg4: memref<8x7xf32, #tpu.memory_space<vmem>>) attributes {dimension_semantics = [#tpu.dimension_semantics<parallel>], iteration_bounds = array<i64: 1>, scalar_prefetch = 0 : i64, scratch_operands = 0 : i64, tpu.core_type = #tpu.core_type<tc>, window_params = [{transform_indices = @transform_0, window_bounds = array<i64: 8, 4123>}, {pipeline_mode = #tpu.pipeline_mode<synchronous>, transform_indices = @transform_1, window_bounds = array<i64: 7, 4123>}, {pipeline_mode = #tpu.pipeline_mode<synchronous>, transform_indices = @transform_2, window_bounds = array<i64: 1, 7>}, {transform_indices = @transform_3, window_bounds = array<i64: 8, 7>}]} {
    %c0 = arith.constant 0 : index
    %c0_0 = arith.constant 0 : index
    %0 = vector.load %arg1[%c0, %c0_0] : memref<8x4123xf32, #tpu.memory_space<vmem>>, vector<8x4123xf32>
    %c0_1 = arith.constant 0 : index
    %c0_2 = arith.constant 0 : index
    %1 = vector.load %arg2[%c0_1, %c0_2] : memref<7x4123xf32, #tpu.memory_space<vmem>>, vector<7x4123xf32>
    %cst = arith.constant dense<0.000000e+00> : vector<8x7xf32>
    %2 = tpu.matmul %0, %1, %cst {dimension_numbers = #tpu.dot_dimension_numbers<[1], [1], [0], [0], [0, 0, 1, 0], [], []>} : vector<8x4123xf32>, vector<7x4123xf32>, vector<8x7xf32> -> vector<8x7xf32>
    %c0_3 = arith.constant 0 : index
    %c0_4 = arith.constant 0 : index
    %3 = vector.load %arg3[%c0_3, %c0_4] : memref<1x7xf32, #tpu.memory_space<vmem>>, vector<1x7xf32>
    %4 = vector.broadcast %3 : vector<1x7xf32> to vector<8x7xf32>
    %5 = arith.addf %2, %4 : vector<8x7xf32>
    %6 = arith.negf %5 : vector<8x7xf32>
    %7 = math.exp %6 : vector<8x7xf32>
    %cst_5 = arith.constant 1.000000e+00 : f32
    %8 = vector.broadcast %cst_5 : f32 to vector<8x7xf32>
    %9 = arith.addf %8, %7 : vector<8x7xf32>
    %10 = arith.divf %8, %9 : vector<8x7xf32>
    %c0_6 = arith.constant 0 : index
    %c0_7 = arith.constant 0 : index
    %11 = vector.load %arg4[%c0_6, %c0_7] : memref<8x7xf32, #tpu.memory_space<vmem>>, vector<8x7xf32>
    tpu.vector_store %arg4[%c0_6, %c0_7], %10 {strides = array<i32>} : memref<8x7xf32, #tpu.memory_space<vmem>>, vector<8x7xf32>,
    return
  }
  func.func @transform_0(%arg0: i32) -> (i32, i32) {
    %c0_i32 = arith.constant 0 : i32
    %c0_i32_0 = arith.constant 0 : i32
    return %arg0, %c0_i32 : i32, i32
  }
  func.func @transform_1(%arg0: i32) -> (i32, i32) {
    %c0_i32 = arith.constant 0 : i32
    %c0_i32_0 = arith.constant 0 : i32
    %c0_i32_1 = arith.constant 0 : i32
    return %c0_i32, %c0_i32_0 : i32, i32
  }
  func.func @transform_2(%arg0: i32) -> (i32, i32) {
    %c0_i32 = arith.constant 0 : i32
    %c0_i32_0 = arith.constant 0 : i32
    %c0_i32_1 = arith.constant 0 : i32
    return %c0_i32, %c0_i32_0 : i32, i32
  }
  func.func @transform_3(%arg0: i32) -> (i32, i32) {
    %c0_i32 = arith.constant 0 : i32
    %c0_i32_0 = arith.constant 0 : i32
    return %arg0, %c0_i32 : i32, i32
  }
}

</mosaic_0001>

<bundles_post_ra>
// kernel: audio_sensory_forward.1
= control target key start
LH: loop header
LB: loop body
LE: loop exit
PB: predicated region body
PF: predicated region fallthrough
CT: control target
= control target key end

     0   :  { %8 = vsyncpa [#allocation3], 0  ;;  %s1946_s0 = inlined_call_operand.hbm [shape: f32[2,4123], index: 0, kind: input, shape index: {}]   ;;  %s1947_s1 = inlined_call_operand.hbm [shape: f32[7,4123], index: 1, kind: input, shape index: {}]   ;;  %s1948_s2 = inlined_call_operand.vmem [shape: f32[1,7], index: 2, kind: input, shape index: {}]   ;;  %s1949_s3 = inlined_call_operand.hbm [shape: f32[2,7], index: 3, kind: output, shape index: {}]  }
   0x1   :  { %9 = vsyncpa [#allocation6], 0 }
   0x2   :  { %10 = vsyncpa [#allocation4], 0 }
   0x3   :  { %15 = vsyncadd [#allocation3], 3168  ;;  %s1841_s12 = smov [#allocation2]   ;;  %s1769_s16 = scalar_lea.hbm %s1946_s0, 1056 }
   0x4   :  { %s16_s13 = sshll.u32 %s1841_s12, 4  ;;  %p1770_p0 = scmp.ne.s32.totalorder %s1946_s0, %s1769_s16  ;;  %s17_s13 = int_to_ptr.vmem [resolvable:$true] %s16_s13 }
   0x5   :  { %p1773_p1 = scmp.lt.u32.totalorder %s1769_s16, %s1946_s0 }
   0x7   :  { %p1775_p2 = pnand %p1773_p1, %p1770_p0 }
   0x9   :  { %1778 = shalt.err (!%p1775_p2)
}
   0xa   :  { %s1779_s21 = scalar_lea.vmem %s17_s13, 1056  ;;  %s1783_s22 = scalar_lea.vmem %s17_s13, 4224 }
   0xb   :  { %p1780_p3 = scmp.ne.s32.totalorder %s17_s13, %s1779_s21  ;;  %p1784_p4 = scmp.lt.s32.totalorder %s17_s13, %s17_s13 }
   0xc   :  { %p1785_p5 = scmp.lt.s32.totalorder %s1783_s22, %s1779_s21 }
   0xe   :  { %p1786_p6 = por %p1785_p5, %p1784_p4 }
  0x10   :  { %p1787_p7 = pnand %p1786_p6, %p1780_p3 }
  0x12   :  { %1790 = shalt.err (!%p1787_p7)
}
  0x13   :  { %s1842_s23 = smov 1056   ;;  %s1843_s24 = smov 66  }
  0x14   :  { %22 = dma.hbm_to_vmem [thread:$0]  %s1946_s0, 1056, %s17_s13, [#allocation3], %s1842_s23, %s1842_s23, %s1843_s24  }
  0x15   :  { %s1844_s27 = smov [#allocation5]   ;;  %s1791_s4 = scalar_lea.hbm %s1947_s1, 4224 }
  0x16   :  { %s29_s28 = sshll.u32 %s1844_s27, 4  ;;  %p1792_p8 = scmp.ne.s32.totalorder %s1947_s1, %s1791_s4  ;;  %s30_s28 = int_to_ptr.vmem [resolvable:$true] %s29_s28 }
  0x17   :  { %p1795_p9 = scmp.lt.u32.totalorder %s1791_s4, %s1947_s1 }
  0x19   :  { %p1797_p10 = pnand %p1795_p9, %p1792_p8 }
  0x1b   :  { %1800 = shalt.err (!%p1797_p10)
}
  0x1c   :  { %s1801_s9 = scalar_lea.vmem %s30_s28, 4224  ;;  %p1806_p12 = scmp.lt.s32.totalorder %s30_s28, %s30_s28 }
  0x1d   :  { %p1802_p11 = scmp.ne.s32.totalorder %s30_s28, %s1801_s9  ;;  %p1807_p13 = scmp.lt.s32.totalorder %s1801_s9, %s1801_s9 }
  0x1f   :  { %p1808_p0 = por %p1807_p13, %p1806_p12 }
  0x21   :  { %p1809_p1 = pnand %p1808_p0, %p1802_p11 }
  0x23   :  { %1812 = shalt.err (!%p1809_p1)
}
  0x24   :  { %32 = dma.hbm_to_vmem [thread:$0]  %s1947_s1, 4224, %s30_s28, [#allocation6]  }
  0x25   :  { %1835 = dma.done.wait [#allocation3], 4224  }
  0x26   :  { %1836 = vsyncadd [#allocation3], 4294963072 }
  0x27   :  { %1837 = dma.done.wait [#allocation6], 4224  }
  0x28   :  { %1838 = vsyncadd [#allocation6], 4294963072  ;;  %v160_v0 = vlaneseq  ;;  %v1845_v1 = vmov 1983009808   ;;  %v94_v5 = vld [vmem:[#allocation5 + $0x88] sm:$0x7f] }
  0x29   :  { %v158_v2 = vunpack.c.l.s4 %v1845_v1  ;;  %v78_v6 = vld [vmem:[#allocation5 + $0x8] sm:$0x7f]  ;;  %v93_v7 = vld [vmem:[#allocation5 + $0x80] sm:$0x7f]  ;;  %1056 = vmatprep.subr.mxu0 %v94_v5  ;;  %v41_v10 = vld [vmem:[#allocation2] sm:$0xff]  ;;  %vm490_vm0 = vcmask 220160  }
  0x2a   :  { %v161_v4 = vshrl.u32 %v160_v0, 7  ;;  %496 = vmatprep.subr.mxu1 %v78_v6  ;;  %v77_v9 = vld [vmem:[#allocation5] sm:$0x7f]  ;;  %1057 = vmatpush1.xpose.msra.mxu0 %v93_v7  ;;  %v45_v16 = vld [vmem:[#allocation2 + $0x20] sm:$0xff]  ;;  %v79_v33 = vld [vmem:[#allocation5 + $0x10] sm:$0x7f] }
  0x2b   :  { %v159_v3 = vunpack.c.0.s8 %v158_v2  ;;  %v50_v11 = vld [vmem:[#allocation2 + $0x42] sm:$0xff]  ;;  %497 = vmatpush1.xpose.msra.mxu1 %v77_v9  ;;  %v51_v40 = vld [vmem:[#allocation2 + $0x4a] sm:$0xff]  ;;  %v95_v49 = vld [vmem:[#allocation5 + $0x90] sm:$0x7f]  ;;  %vm1847_vm1 = vmmov 0   ;;  %vm1692_vm2 = vcmask 56320  }
  0x2c   :  { %v59_v12 = vld [vmem:[#allocation2 + $0x84] sm:$0xff]  ;;  %v153_v14 = vcombine.low %v41_v10, %v50_v11  ;;  %v154_v15 = vcombine.high %v41_v10, %v50_v11  ;;  %v60_v41 = vld [vmem:[#allocation2 + $0x8c] sm:$0xff] }
  0x2d   :  { %v1895_v8 = vsub.s32 %v159_v3, %v161_v4  ;;  %v68_v13 = vld [vmem:[#allocation2 + $0xc6] sm:$0xff]  ;;  %v69_v42 = vld [vmem:[#allocation2 + $0xce] sm:$0xff] }
  0x2e   :  { %v155_v17 = vcombine.low %v59_v12, %v68_v13  ;;  %v156_v18 = vcombine.high %v59_v12, %v68_v13  ;;  %v54_v19 = vld [vmem:[#allocation2 + $0x62] sm:$0xff]  ;;  %v55_v47 = vld [vmem:[#allocation2 + $0x6a] sm:$0xff]  ;;  %v191_v52 = vcombine.low %v60_v41, %v69_v42  ;;  %v192_v3 = vcombine.high %v60_v41, %v69_v42 }
  0x2f   :  { %v63_v20 = vld [vmem:[#allocation2 + $0xa4] sm:$0xff]  ;;  %v163_v22 = vrot.slane %v153_v14, %v1895_v8  ;;  %v297_v23 = vcombine.low %v45_v16, %v54_v19  ;;  %v298_v24 = vcombine.high %v45_v16, %v54_v19  ;;  %v170_v30 = vrot.slane %v154_v15, %v1895_v8  ;;  %v64_v48 = vld [vmem:[#allocation2 + $0xac] sm:$0xff] }
  0x30   :  { %v72_v21 = vld [vmem:[#allocation2 + $0xe6] sm:$0xff]  ;;  %v177_v28 = vrot.slane %v155_v17, %v1895_v8  ;;  %v184_v34 = vrot.slane %v156_v18, %v1895_v8  ;;  %v73_v53 = vld [vmem:[#allocation2 + $0xee] sm:$0xff]  ;;  %v213_v59 = vrot.slane %v191_v52, %v1895_v8  ;;  %v220_v12 = vrot.slane %v192_v3, %v1895_v8  ;;  %v70_v18 = vld [vmem:[#allocation2 + $0xd6] sm:$0xff] }
  0x31   :  { %v299_v25 = vcombine.low %v63_v20, %v72_v21  ;;  %v96_v26 = vld [vmem:[#allocation5 + $0x98] sm:$0x7f]  ;;  %v300_v29 = vcombine.high %v63_v20, %v72_v21  ;;  %v307_v31 = vrot.slane %v297_v23, %v1895_v8  ;;  %v314_v35 = vrot.slane %v298_v24, %v1895_v8  ;;  %v42_v36 = vld [vmem:[#allocation2 + $0x8] sm:$0xff]  ;;  %v98_v54 = vld [vmem:[#allocation5 + $0xa8] sm:$0x7f] }
  0x32   :  { %v80_v27 = vld [vmem:[#allocation5 + $0x18] sm:$0x7f]  ;;  %1126 = vmatprep.subr.mxu0 %v96_v26  ;;  %v186_v37 = vcombine.high %v163_v22, %v177_v28  ;;  %v185_v38 = vcombine.low %v163_v22, %v177_v28  ;;  %v188_v45 = vcombine.high %v170_v30, %v184_v34  ;;  %v46_v46 = vld [vmem:[#allocation2 + $0x28] sm:$0xff]  ;;  %v189_v51 = vcombine.low %v42_v36, %v51_v40  ;;  %v82_v57 = vld [vmem:[#allocation5 + $0x28] sm:$0x7f] }
  0x33   :  { %566 = vmatprep.subr.mxu1 %v80_v27  ;;  %v321_v32 = vrot.slane %v299_v25, %v1895_v8  ;;  %v328_v39 = vrot.slane %v300_v29, %v1895_v8  ;;  %v333_v55 = vcombine.low %v46_v46, %v55_v47  ;;  %v335_v56 = vcombine.low %v64_v48, %v73_v53  ;;  %v81_v0 = vld [vmem:[#allocation5 + $0x20] sm:$0x7f]  ;;  %v100_v9 = vld [vmem:[#allocation5 + $0xb8] sm:$0x7f]  ;;  %v43_v13 = vld [vmem:[#allocation2 + $0x10] sm:$0xff] }
  0x34   :  { %560 = vmatprep.mubr.f32.mxu1 %v186_v37  ;;  %v199_v58 = vrot.slane %v189_v51, %v1895_v8  ;;  %v187_v62 = vcombine.low %v170_v30, %v184_v34  ;;  %v190_v2 = vcombine.high %v42_v36, %v51_v40  ;;  %v97_v4 = vld [vmem:[#allocation5 + $0xa0] sm:$0x7f]  ;;  %v334_v6 = vcombine.high %v46_v46, %v55_v47  ;;  %v84_v10 = vld [vmem:[#allocation5 + $0x38] sm:$0x7f]  ;;  %v52_v14 = vld [vmem:[#allocation2 + $0x52] sm:$0xff] }
  0x35   :  { %v330_v43 = vcombine.high %v307_v31, %v321_v32  ;;  %v329_v44 = vcombine.low %v307_v31, %v321_v32  ;;  %v332_v50 = vcombine.high %v314_v35, %v328_v39  ;;  %561 = vmatmul.mubr.f32.vlgmr.msra.gmra.mrb[0].mxu1 %v185_v38  ;;  %v343_v60 = vrot.slane %v333_v55, %v1895_v8  ;;  %v61_v17 = vld [vmem:[#allocation2 + $0x94] sm:$0xff]  ;;  %v85_v41 = vld [vmem:[#allocation5 + $0x40] sm:$0x7f] }
  0x36   :  { %567 = vmatpush1.xpose.msra.mxu1 %v79_v33  ;;  %630 = vmatprep.mubr.f32.mxu1 %v188_v45  ;;  %v357_v61 = vrot.slane %v335_v56, %v1895_v8  ;;  %v331_v63 = vcombine.low %v314_v35, %v328_v39  ;;  %v222_v1 = vcombine.high %v199_v58, %v213_v59  ;;  %v47_v19 = vld [vmem:[#allocation2 + $0x30] sm:$0xff]  ;;  %v83_v25 = vld [vmem:[#allocation5 + $0x30] sm:$0x7f]  ;;  %v101_v45 = vld [vmem:[#allocation5 + $0xc0] sm:$0x7f] }
  0x37   :  { %1120 = vmatprep.mubr.f32.mxu0 %v330_v43  ;;  %636 = vmatprep.subr.mxu1 %v82_v57  ;;  %v336_v7 = vcombine.high %v64_v48, %v73_v53  ;;  %v206_v11 = vrot.slane %v190_v2, %v1895_v8  ;;  %v350_v15 = vrot.slane %v334_v6, %v1895_v8  ;;  %v56_v21 = vld [vmem:[#allocation2 + $0x72] sm:$0xff]  ;;  %v62_v57 = vld [vmem:[#allocation2 + $0x9c] sm:$0xff] }
  0x38   :  { %1121 = vmatmul.mubr.f32.vlgmr.msra.gmra.mrb[0].mxu0 %v329_v44  ;;  %v366_v5 = vcombine.high %v343_v60, %v357_v61  ;;  %v221_v20 = vcombine.low %v199_v58, %v213_v59  ;;  %v65_v22 = vld [vmem:[#allocation2 + $0xb4] sm:$0xff]  ;;  %v365_v24 = vcombine.low %v343_v60, %v357_v61  ;;  %v225_v27 = vcombine.low %v43_v13, %v52_v14  ;;  %v71_v58 = vld [vmem:[#allocation2 + $0xde] sm:$0xff] }
  0x39   :  { %1127 = vmatpush1.xpose.msra.mxu0 %v95_v49  ;;  %1190 = vmatprep.mubr.f32.mxu0 %v332_v50  ;;  %v364_v16 = vrot.slane %v336_v7, %v1895_v8  ;;  %v74_v23 = vld [vmem:[#allocation2 + $0xf6] sm:$0xff]  ;;  %v224_v26 = vcombine.high %v206_v11, %v220_v12  ;;  %v227_v28 = vcombine.low %v61_v17, %v70_v18  ;;  %v104_v49 = vld [vmem:[#allocation5 + $0xd8] sm:$0x7f] }
  0x3a   :  { %1196 = vmatprep.subr.mxu0 %v98_v54  ;;  %v99_v29 = vld [vmem:[#allocation5 + $0xb0] sm:$0x7f]  ;;  %v369_v31 = vcombine.low %v47_v19, %v56_v21  ;;  %v371_v32 = vcombine.low %v65_v22, %v74_v23  ;;  %v102_v33 = vld [vmem:[#allocation5 + $0xc8] sm:$0x7f]  ;;  %v235_v35 = vrot.slane %v225_v27, %v1895_v8  ;;  %v223_v39 = vcombine.low %v206_v11, %v220_v12  ;;  %v88_v50 = vld [vmem:[#allocation5 + $0x58] sm:$0x7f] }
  0x3b   :  { %v368_v30 = vcombine.high %v350_v15, %v364_v16  ;;  %v86_v34 = vld [vmem:[#allocation5 + $0x48] sm:$0x7f]  ;;  %v249_v36 = vrot.slane %v227_v28, %v1895_v8  ;;  %v367_v40 = vcombine.low %v350_v15, %v364_v16  ;;  %v226_v43 = vcombine.high %v43_v13, %v52_v14  ;;  %v44_v53 = vld [vmem:[#allocation2 + $0x18] sm:$0xff]  ;;  %v92_v27 = vld [vmem:[#allocation5 + $0x78] sm:$0x7f] }
  0x3c   :  { %v379_v37 = vrot.slane %v369_v31, %v1895_v8  ;;  %v393_v38 = vrot.slane %v371_v32, %v1895_v8  ;;  %v228_v44 = vcombine.high %v61_v17, %v70_v18  ;;  %v370_v47 = vcombine.high %v47_v19, %v56_v21  ;;  %v53_v54 = vld [vmem:[#allocation2 + $0x5a] sm:$0xff]  ;;  %v90_v11 = vld [vmem:[#allocation5 + $0x68] sm:$0x7f]  ;;  %v89_v18 = vld [vmem:[#allocation5 + $0x60] sm:$0x7f] }
  0x3d   :  { %631 = vmatmul.mubr.f32.vlgmr.msra.gmra.mrb[0].mxu1 %v187_v62  ;;  %v258_v42 = vcombine.high %v235_v35, %v249_v36  ;;  %v372_v48 = vcombine.high %v65_v22, %v74_v23  ;;  %v242_v51 = vrot.slane %v226_v43, %v1895_v8  ;;  %v48_v59 = vld [vmem:[#allocation2 + $0x38] sm:$0xff]  ;;  %v257_v60 = vcombine.low %v235_v35, %v249_v36  ;;  %v105_v22 = vld [vmem:[#allocation5 + $0xe0] sm:$0x7f] }
  0x3e   :  { %637 = vmatpush1.xpose.msra.mxu1 %v81_v0  ;;  %700 = vmatprep.mubr.f32.mxu1 %v222_v1  ;;  %v402_v46 = vcombine.high %v379_v37, %v393_v38  ;;  %v256_v52 = vrot.slane %v228_v44, %v1895_v8  ;;  %v386_v55 = vrot.slane %v370_v47, %v1895_v8  ;;  %v57_v61 = vld [vmem:[#allocation2 + $0x7a] sm:$0xff]  ;;  %v109_v47 = vld [vmem:[#allocation5 + $0x100] sm:$0x7f] }
  0x3f   :  { %706 = vmatprep.subr.mxu1 %v84_v10  ;;  %v400_v56 = vrot.slane %v372_v48, %v1895_v8  ;;  %v66_v62 = vld [vmem:[#allocation2 + $0xbc] sm:$0xff]  ;;  %v401_v0 = vcombine.low %v379_v37, %v393_v38  ;;  %v261_v3 = vcombine.low %v44_v53, %v53_v54  ;;  %v405_v7 = vcombine.low %v48_v59, %v57_v61  ;;  %v106_v10 = vld [vmem:[#allocation5 + $0xe8] sm:$0x7f] }
  0x40   :  { %1191 = vmatmul.mubr.f32.vlgmr.msra.gmra.mrb[0].mxu0 %v331_v63  ;;  %v75_v63 = vld [vmem:[#allocation2 + $0xfe] sm:$0xff]  ;;  %v260_v2 = vcombine.high %v242_v51, %v256_v52  ;;  %v259_v16 = vcombine.low %v242_v51, %v256_v52  ;;  %v264_v21 = vcombine.high %v62_v57, %v71_v58 }
  0x41   :  { %1197 = vmatpush1.xpose.msra.mxu0 %v97_v4  ;;  %1260 = vmatprep.mubr.f32.mxu0 %v366_v5  ;;  %v87_v1 = vld [vmem:[#allocation5 + $0x50] sm:$0x7f]  ;;  %v263_v4 = vcombine.low %v62_v57, %v71_v58  ;;  %v404_v6 = vcombine.high %v386_v55, %v400_v56  ;;  %v271_v12 = vrot.slane %v261_v3, %v1895_v8  ;;  %v49_v38 = vld [vmem:[#allocation2 + $0x40] sm:$0x3] }
  0x42   :  { %1266 = vmatprep.subr.mxu0 %v100_v9  ;;  %v103_v5 = vld [vmem:[#allocation5 + $0xd0] sm:$0x7f]  ;;  %v407_v9 = vcombine.low %v66_v62, %v75_v63  ;;  %v415_v14 = vrot.slane %v405_v7, %v1895_v8  ;;  %v403_v17 = vcombine.low %v386_v55, %v400_v56 }
  0x43   :  { %v285_v13 = vrot.slane %v263_v4, %v1895_v8  ;;  %v107_v36 = vld [vmem:[#allocation5 + $0xf0] sm:$0x7f] }
  0x44   :  { %v429_v15 = vrot.slane %v407_v9, %v1895_v8 }
  0x45   :  { %701 = vmatmul.mubr.f32.vlgmr.msra.gmra.mrb[0].mxu1 %v221_v20  ;;  %v294_v19 = vcombine.high %v271_v12, %v285_v13  ;;  %v262_v20 = vcombine.high %v44_v53, %v53_v54  ;;  %v293_v32 = vcombine.low %v271_v12, %v285_v13  ;;  %v1712_v53 = vld [vmem:[%s1948_s2] ss:$0 sm:$0xff] }
  0x46   :  { %707 = vmatpush1.xpose.msra.mxu1 %v83_v25  ;;  %770 = vmatprep.mubr.f32.mxu1 %v224_v26  ;;  %v438_v23 = vcombine.high %v415_v14, %v429_v15  ;;  %v408_v25 = vcombine.high %v66_v62, %v75_v63  ;;  %v108_v26 = vld [vmem:[#allocation5 + $0xf8] sm:$0x7f] }
  0x47   :  { %776 = vmatprep.subr.mxu1 %v86_v34  ;;  %v278_v28 = vrot.slane %v262_v20, %v1895_v8  ;;  %v91_v34 = vld [vmem:[#allocation5 + $0x70] sm:$0x7f] }
  0x48   :  { %1261 = vmatmul.mubr.f32.vlgmr.msra.gmra.mrb[0].mxu0 %v365_v24  ;;  %v406_v24 = vcombine.high %v48_v59, %v57_v61  ;;  %v436_v31 = vrot.slane %v408_v25, %v1895_v8 }
  0x49   :  { %1267 = vmatpush1.xpose.msra.mxu0 %v99_v29  ;;  %1330 = vmatprep.mubr.f32.mxu0 %v368_v30  ;;  %v292_v29 = vrot.slane %v264_v21, %v1895_v8 }
  0x4a   :  { %1336 = vmatprep.subr.mxu0 %v102_v33  ;;  %v422_v30 = vrot.slane %v406_v24, %v1895_v8  ;;  %v437_v33 = vcombine.low %v415_v14, %v429_v15 }
  0x4b   :  { %v296_v35 = vcombine.high %v278_v28, %v292_v29  ;;  %v295_v43 = vcombine.low %v278_v28, %v292_v29 }
  0x4c   :  { %v440_v37 = vcombine.high %v422_v30, %v436_v31  ;;  %v439_v44 = vcombine.low %v422_v30, %v436_v31 }
  0x4d   :  { %771 = vmatmul.mubr.f32.vlgmr.msra.gmra.mrb[0].mxu1 %v223_v39  ;;  %v58_v39 = vld [vmem:[#allocation2 + $0x82] sm:$0x3] }
  0x4e   :  { %777 = vmatpush1.xpose.msra.mxu1 %v85_v41  ;;  %840 = vmatprep.mubr.f32.mxu1 %v258_v42  ;;  %v76_v41 = vld [vmem:[#allocation2 + $0x106] sm:$0x3]  ;;  %v1846_v42 = vmov 0.0  }
  0x4f   :  { %846 = vmatprep.subr.mxu1 %v88_v50 }
  0x50   :  { %1331 = vmatmul.mubr.f32.vlgmr.msra.gmra.mrb[0].mxu0 %v367_v40  ;;  %v67_v40 = vld [vmem:[#allocation2 + $0xc4] sm:$0x3] }
  0x51   :  { %1337 = vmatpush1.xpose.msra.mxu0 %v101_v45  ;;  %1400 = vmatprep.mubr.f32.mxu0 %v402_v46  ;;  %v441_v45 = vcombine.low %v49_v38, %v58_v39  ;;  %v442_v46 = vcombine.low %v67_v40, %v76_v41 }
  0x52   :  { %1406 = vmatprep.subr.mxu0 %v104_v49 }
  0x53   :  { %v449_v48 = vrot.slane %v441_v45, %v1895_v8  ;;  %v456_v49 = vrot.slane %v442_v46, %v1895_v8 }
  0x55   :  { %841 = vmatmul.mubr.f32.vlgmr.msra.gmra.mrb[0].mxu1 %v257_v60  ;;  %v457_v50 = vcombine.low %v449_v48, %v456_v49 }
  0x56   :  { %847 = vmatpush1.xpose.msra.mxu1 %v87_v1  ;;  %910 = vmatprep.mubr.f32.mxu1 %v260_v2 }
  0x57   :  { %916 = vmatprep.subr.mxu1 %v90_v11 }
  0x58   :  { %1401 = vmatmul.mubr.f32.vlgmr.msra.gmra.mrb[0].mxu0 %v401_v0 }
  0x59   :  { %1407 = vmatpush1.xpose.msra.mxu0 %v103_v5  ;;  %1470 = vmatprep.mubr.f32.mxu0 %v404_v6 }
  0x5a   :  { %1476 = vmatprep.subr.mxu0 %v106_v10 }
  0x5d   :  { %911 = vmatmul.mubr.f32.vlgmr.msra.gmra.mrb[0].mxu1 %v259_v16 }
  0x5e   :  { %917 = vmatpush1.xpose.msra.mxu1 %v89_v18  ;;  %980 = vmatprep.mubr.f32.mxu1 %v294_v19 }
  0x5f   :  { %986 = vmatprep.subr.mxu1 %v92_v27 }
  0x60   :  { %1471 = vmatmul.mubr.f32.vlgmr.msra.gmra.mrb[0].mxu0 %v403_v17 }
  0x61   :  { %1477 = vmatpush1.xpose.msra.mxu0 %v105_v22  ;;  %1540 = vmatprep.mubr.f32.mxu0 %v438_v23 }
  0x62   :  { %1546 = vmatprep.subr.mxu0 %v108_v26 }
  0x65   :  { %981 = vmatmul.mubr.f32.vlgmr.msra.gmra.mrb[0].mxu1 %v293_v32 }
  0x66   :  { %987 = vmatpush1.xpose.msra.mxu1 %v91_v34  ;;  %1050 = vmatprep.mubr.f32.mxu1 %v296_v35 }
  0x68   :  { %1541 = vmatmul.mubr.f32.vlgmr.msra.gmra.mrb[0].mxu0 %v437_v33 }
  0x69   :  { %1547 = vmatpush1.xpose.msra.mxu0 %v107_v36  ;;  %1610 = vmatprep.mubr.f32.mxu0 %v440_v37 }
  0x6a   :  { %1718 = vmatprep.subr.mxu0 %v1846_v42 }
  0x6d   :  { %1051 = vmatmul.mubr.f32.vlgmr.msra.gmra.mrb[0].mxu1 %v295_v43 }
  0x70   :  { %1611 = vmatmul.mubr.f32.vlgmr.msra.gmra.mrb[0].mxu0 %v439_v44 }
  0x71   :  { %1719 = vmatpush3.xpose.msk.msra.mxu0 %vm490_vm0, %v109_v47  ;;  %1720 = vmatprep.mubr.msk.f32.mxu0 %vm1847_vm1, %v1846_v42 }
  0x78   :  { %1721 = vmatmul.mubr.msk.f32.vlgmr.msra.gmra.mrb[0].mxu0 %vm490_vm0, %v457_v50 }
 0x140   :  { %v1052_v51 = vpop.f32.mrb[0].mxu1 }
 0x141   :  { %v1054_v52 = vpop.f32.mrb[1].mxu1  ;;  %v1723_v54 = vadd.f32 %v1712_v53, %v1052_v51 }
 0x14b   :  { %v1682_v55 = vpop.f32.mrb[0].mxu0 }
 0x14c   :  { %v1724_v56 = vadd.f32 %v1723_v54, %v1682_v55  ;;  %v1722_v57 = vpop.f32.mrb[1].mxu0 }
 0x14e   :  { %v1715_v58 = vmul.f32 -1.442695, %v1724_v56 }
 0x150   :  { %1765 = vpow2.f32 %v1715_v58 }
 0x15a   :  { %v1766_v59 = vpop.eup %1765 }
 0x15b   :  { %v1689_v60 = vadd.f32 1.0, %v1766_v59 }
 0x15d   :  { %1767 = vrcp.f32 %v1689_v60 }
 0x167   :  { %v1768_v8 = vpop.eup %1767 }
 0x168   :  { %1693 = vst.msk [vmem:[#allocation7] sm:$0xff] %vm1692_vm2, %v1768_v8 }
 0x169   :  { %1698 = vsyncadd [#allocation4], 96  ;;  %s1848_s12 = smov [#allocation7]  }
 0x16a   :  { %s1699_s13 = sshll.u32 %s1848_s12, 4  ;;  %s1700_s13 = int_to_ptr.vmem [resolvable:$true] %s1699_s13 }
 0x16b   :  { %s1813_s14 = scalar_lea.vmem %s1700_s13, 32  ;;  %s1817_s15 = scalar_lea.vmem %s1700_s13, 128 }
 0x16c   :  { %p1814_p2 = scmp.ne.s32.totalorder %s1700_s13, %s1813_s14  ;;  %p1818_p3 = scmp.lt.s32.totalorder %s1700_s13, %s1700_s13 }
 0x16d   :  { %p1819_p4 = scmp.lt.s32.totalorder %s1817_s15, %s1813_s14 }
 0x16f   :  { %p1820_p5 = por %p1819_p4, %p1818_p3 }
 0x171   :  { %p1821_p6 = pnand %p1820_p5, %p1814_p2 }
 0x173   :  { %1824 = shalt.err (!%p1821_p6)
}
 0x174   :  { %s1825_s17 = scalar_lea.hbm %s1949_s3, 32 }
 0x175   :  { %p1826_p7 = scmp.ne.s32.totalorder %s1949_s3, %s1825_s17  ;;  %p1829_p8 = scmp.lt.u32.totalorder %s1825_s17, %s1949_s3 }
 0x177   :  { %p1831_p9 = pnand %p1829_p8, %p1826_p7 }
 0x179   :  { %1834 = shalt.err (!%p1831_p9)
}
 0x17a   :  { %s1849_s22 = smov 32   ;;  %s1850_s23 = smov 2  }
 0x17b   :  { %1705 = dma.vmem_to_hbm [thread:$0]  %s1700_s13, 32, %s1949_s3, [#allocation4], %s1849_s22, %s1849_s22, %s1850_s23  }
 0x17c   :  { %1839 = dma.done.wait [#allocation4], 128  }
 0x17d   :  { %1840 = vsyncadd [#allocation4], 4294967168 }
 0x17e   :  { %1709 = vsyncpa [#allocation3], 1 }
 0x17f   :  { %1710 = vsyncpa [#allocation6], 1 }
 0x180   :  { %1711 = vsyncpa [#allocation4], 1 }

</bundles_post_ra>
